<compile_context>
chip_gen: v5e
topology: v5e:2x2
jax: 0.10.0
libtpu: 0.0.40
codegen_flags: <defaults>
</compile_context>

<pallas_src>
import math
import functools

import jax
import jax.numpy as jnp
from jax.experimental import pallas as pl
from jax.experimental.pallas import tpu as pltpu


# ----------------------------- parameter setup (glue) -----------------------

def make_positional_encoding_table(max_len: int, d_model: int,
                                   dtype=jnp.float32) -> jnp.ndarray:
    """Reproduces the `pe` buffer from the PyTorch __init__ (shape (max_len, d_model))."""
    position = jnp.arange(max_len, dtype=jnp.float32)[:, None]                # (max_len, 1)
    div_term = jnp.exp(
        jnp.arange(0, d_model, 2, dtype=jnp.float32) * (-math.log(10000.0) / d_model)
    )                                                                          # (d_model//2,)
    angles = position * div_term                                               # (max_len, d_model//2)
    pe = jnp.zeros((max_len, d_model), jnp.float32)
    pe = pe.at[:, 0::2].set(jnp.sin(angles))
    pe = pe.at[:, 1::2].set(jnp.cos(angles))
    return pe.astype(dtype)


# ----------------------------- Pallas kernels -------------------------------

def _pe_add_kernel(x_ref, pe_ref, o_ref):
    # x_ref / pe_ref / o_ref: (TS, D) tiles, all in x.dtype (no promotion).
    o_ref[...] = x_ref[...] + pe_ref[...]


def _pe_add_dropout_kernel(x_ref, pe_ref, bits_ref, o_ref, *, p):
    # Training-mode inverted dropout.  Keep-mask is a pure uint32 threshold
    # compare on pre-generated random bits (no int->float convert).
    y = x_ref[...] + pe_ref[...]                                   # input dtype
    thresh = jnp.uint32(min(int(p * 4294967296.0), 4294967295))    # p * 2^32
    keep = bits_ref[...] >= thresh                                 # P(keep) = 1 - p
    scale = jnp.asarray(1.0 / (1.0 - p), dtype=y.dtype)
    o_ref[...] = jnp.where(keep, y * scale, jnp.zeros_like(y))


# ----------------------------- tiling helper ---------------------------------

def _choose_seq_tile(S: int, D: int, itemsize: int) -> int:
    """~1 MiB x-blocks: fits default scoped VMEM on v5e/v6e/v7x with
    double-buffered x/out/bits + resident pe, in the 512-1024-row sweet spot
    measured for streaming adds."""
    target_bytes = 1 << 20
    ts = (target_bytes // max(1, D * itemsize)) // 8 * 8   # multiple of 8 (sublane)
    ts = max(8, min(ts, 1024))
    return S if S <= ts else ts


# ----------------------------- wrapper ---------------------------------------

def positional_encoding_forward(x, pe, *, dropout_p=0.0, training=False,
                                rng_key=None):
    """x: (B, S, D); pe: (max_len, D). Returns dropout(x + pe[:S])."""
    B, S, D = x.shape
    pe_s = pe[:S].astype(x.dtype)                     # (S, D), x's dtype end-to-end
    TS = _choose_seq_tile(S, D, jnp.dtype(x.dtype).itemsize)
    ns = pl.cdiv(S, TS)

    x_spec = pl.BlockSpec((None, TS, D), lambda s, b: (b, s, 0))
    pe_spec = pl.BlockSpec((TS, D), lambda s, b: (s, 0))   # resident across b
    cparams = pltpu.CompilerParams(
        dimension_semantics=("parallel", "parallel"))

    if (not training) or dropout_p <= 0.0:
        # eval mode: dropout is identity (matches nn.Dropout in .eval())
        return pl.pallas_call(
            _pe_add_kernel,
            out_shape=jax.ShapeDtypeStruct((B, S, D), x.dtype),
            grid=(ns, B),                                   # batch innermost
            in_specs=[x_spec, pe_spec],
            out_specs=x_spec,
            compiler_params=cparams,
            input_output_aliases={0: 0},                    # write out in place of x
        )(x, pe_s)

    if dropout_p >= 1.0:
        # matches torch.nn.Dropout(p=1.0): everything dropped
        return jnp.zeros_like(x)

    # training mode: inverted dropout fused inside the kernel.
    # TODO(synk): cannot bit-match torch's RNG stream; semantics (Bernoulli keep,
    # 1/(1-p) scaling) match.  Random bits are generated host-side because the
    # in-kernel pltpu.prng_* primitives only lower on the real TPU backend.
    if rng_key is None:
        rng_key = jax.random.PRNGKey(0)
    bits = jax.random.bits(rng_key, (B, S, D), jnp.uint32)
    kernel = functools.partial(_pe_add_dropout_kernel, p=float(dropout_p))
    bits_spec = pl.BlockSpec((None, TS, D), lambda s, b: (b, s, 0))
    return pl.pallas_call(
        kernel,
        out_shape=jax.ShapeDtypeStruct((B, S, D), x.dtype),
        grid=(ns, B),
        in_specs=[x_spec, pe_spec, bits_spec],
        out_specs=x_spec,
        compiler_params=cparams,
        input_output_aliases={0: 0},                        # x -> out
    )(x, pe_s, bits)


# ----------------------------- demo / check ----------------------------------

if __name__ == "__main__":
    # matches the module docstring convention, e.g. (batch, seq, d_model=128)
    B, S, D = 2, 8, 128
    MAX_LEN = 64                # small stand-in for max_len=5000
    DROPOUT_P = 0.1

    key = jax.random.PRNGKey(0)
    x = jax.random.normal(key, (B, S, D), dtype=jnp.float32)
    pe = make_positional_encoding_table(MAX_LEN, D, dtype=jnp.float32)

    ref = x + pe[None, :S, :]   # pure-JAX reference

    # eval-mode forward (dropout = identity)
    out = positional_encoding_forward(x, pe, dropout_p=DROPOUT_P, training=False)
    out = jax.block_until_ready(out)
    assert out.shape == (B, S, D) and out.dtype == x.dtype
    assert jnp.allclose(out, ref, atol=1e-6, rtol=1e-6)

    # training-mode forward: every element must be 0 or (x+pe)/(1-p)
    out_tr = positional_encoding_forward(x, pe, dropout_p=DROPOUT_P,
                                         training=True,
                                         rng_key=jax.random.PRNGKey(42))
    out_tr = jax.block_until_ready(out_tr)
    scaled = ref / (1.0 - DROPOUT_P)
    ok = jnp.isclose(out_tr, 0.0, atol=1e-6) | jnp.isclose(out_tr, scaled,
                                                           atol=1e-4, rtol=1e-4)
    assert out_tr.shape == (B, S, D) and bool(jnp.all(ok))

    print("KERNEL_OK")
</pallas_src>

<mosaic_0001>
module attributes {stable_mosaic.version = 11 : i64} {
  func.func @_pe_add_kernel(%arg0: i32, %arg1: i32, %arg2: memref<1x8x128xf32, #tpu.memory_space<vmem>>, %arg3: memref<8x128xf32, #tpu.memory_space<vmem>>, %arg4: memref<1x8x128xf32, #tpu.memory_space<vmem>>) attributes {dimension_semantics = [#tpu.dimension_semantics<parallel>, #tpu.dimension_semantics<parallel>], iteration_bounds = array<i64: 1, 2>, scalar_prefetch = 0 : i64, scratch_operands = 0 : i64, tpu.core_type = #tpu.core_type<tc>, window_params = [{transform_indices = @transform_0, window_bounds = array<i64: 1, 8, 128>}, {transform_indices = @transform_1, window_bounds = array<i64: 8, 128>}, {transform_indices = @transform_2, window_bounds = array<i64: 1, 8, 128>}]} {
    %c0 = arith.constant 0 : index
    %c0_0 = arith.constant 0 : index
    %c0_1 = arith.constant 0 : index
    %0 = vector.load %arg2[%c0, %c0_0, %c0_1] : memref<1x8x128xf32, #tpu.memory_space<vmem>>, vector<1x8x128xf32>
    %1 = vector.shape_cast %0 : vector<1x8x128xf32> to vector<8x128xf32>
    %c0_2 = arith.constant 0 : index
    %c0_3 = arith.constant 0 : index
    %2 = vector.load %arg3[%c0_2, %c0_3] : memref<8x128xf32, #tpu.memory_space<vmem>>, vector<8x128xf32>
    %3 = arith.addf %1, %2 : vector<8x128xf32>
    %c0_4 = arith.constant 0 : index
    %c0_5 = arith.constant 0 : index
    %c0_6 = arith.constant 0 : index
    %4 = vector.load %arg4[%c0_4, %c0_5, %c0_6] : memref<1x8x128xf32, #tpu.memory_space<vmem>>, vector<1x8x128xf32>
    %5 = vector.shape_cast %4 : vector<1x8x128xf32> to vector<8x128xf32>
    %6 = vector.shape_cast %3 : vector<8x128xf32> to vector<1x8x128xf32>
    tpu.vector_store %arg4[%c0_4, %c0_5, %c0_6], %6 {strides = array<i32>} : memref<1x8x128xf32, #tpu.memory_space<vmem>>, vector<1x8x128xf32>,
    return
  }
  func.func @transform_0(%arg0: i32, %arg1: i32) -> (i32, i32, i32) {
    %c0_i32 = arith.constant 0 : i32
    %c0_i32_0 = arith.constant 0 : i32
    return %arg1, %arg0, %c0_i32 : i32, i32, i32
  }
  func.func @transform_1(%arg0: i32, %arg1: i32) -> (i32, i32) {
    %c0_i32 = arith.constant 0 : i32
    %c0_i32_0 = arith.constant 0 : i32
    return %arg0, %c0_i32 : i32, i32
  }
  func.func @transform_2(%arg0: i32, %arg1: i32) -> (i32, i32, i32) {
    %c0_i32 = arith.constant 0 : i32
    %c0_i32_0 = arith.constant 0 : i32
    return %arg1, %arg0, %c0_i32 : i32, i32, i32
  }
}

</mosaic_0001>

<bundles_post_ra>
// kernel: tpu_custom_call.1
= control target key start
LH: loop header
LB: loop body
LE: loop exit
PB: predicated region body
PF: predicated region fallthrough
CT: control target
= control target key end

     0   :  { %7 = vsyncpa [#allocation3], 0  ;;  %s639_s0 = inlined_call_operand.hbm [shape: f32[2,8,128], index: 0, kind: input, shape index: {}, may-alias: {0,2}]   ;;  %s640_s1 = inlined_call_operand.vmem [shape: f32[8,128], index: 1, kind: input, shape index: {}]   ;;  %s641_s2 = inlined_call_operand.hbm [shape: f32[2,8,128], index: 2, kind: output, shape index: {}, may-alias: {0,2}]  }
   0x1   :  { %9 = vsyncpa [#allocation3 + $0x1], 0 }
   0x2   :  { %10 = vsyncpa [#allocation4], 0 }
   0x3   :  { %12 = vsyncpa [#allocation4 + $0x1], 0  ;;  %s516_s9 = smov 0   ;;  %s518_s10 = smov 0  }
   0x4   :  { %s520_s11 = smov 0   ;;  %s522_s12 = smov 0  }
   0x5   :  { %s524_s13 = smov 0   ;;  %s526_s14 = smov 0  }
   0x6 LB: > { %s311_s15 = sadd.s32 4294967295, %s499_s14   ;;  %s312_s16 = sadd.s32 4294967294, %s499_s14   ;;  %s499_s14 = sphi %s526_s14, %s18_s14   ;;  %s495_s13 = sphi %s524_s13, %s650_s13   ;;  %s491_s12 = sphi %s522_s12, %s649_s12   ;;  %s487_s11 = sphi %s520_s11, %s648_s11   ;;  %s483_s10 = sphi %s518_s10, %s647_s10   ;;  %s479_s9 = sphi %s516_s9, %s646_s9  }
   0x7   : > { %s27_s17 = sadd.s32 1, %s495_s13  ;;  %s39_s18 = sadd.s32 1, %s487_s11 }
   0x8   : > { %p28_p0 = scmp.ge.s32.totalorder %s27_s17, 2  ;;  %p46_p1 = scmp.ne.s32.totalorder %s487_s11, %s483_s10 }
   0x9   : > { %p47_p2 = scmp.eq.s32.totalorder %s499_s14, 0  ;;  %p52_p3 = scmp.ne.s32.totalorder %s483_s10, %s479_s9 }
   0xa   : > { %s652_s17 = smov (%p28_p0, %s27_s17), 0  ;;  %p53_p5 = scmp.eq.s32.totalorder %s311_s15, 0 }
   0xb   : > { %p557_p4 = por %p47_p2, %p46_p1  ;;  %s34_s20 = ssub.s32 %s495_s13, %s652_s17 }
   0xc   : > { %p104_p6 = scmp.eq.s32.totalorder %s311_s15, 1  ;;  %p37_p7 = scmp.eq.s32.totalorder %s34_s20, 0 }
   0xd   : > { %p563_p8 = por %p53_p5, %p52_p3  ;;  %p110_p10 = scmp.eq.s32.totalorder %s312_s16, 1 }
   0xe   : > { %p567_p9 = por %p104_p6, %p46_p1  ;;  %p315_p12 = scmp.ge.s32.totalorder %s499_s14, 2 }
   0xf   : > { %s572_s23 = scalar_select %p37_p7, %s487_s11, %s39_s18  }
  0x10   : > { %p574_p11 = por %p110_p10, %p52_p3  ;;  %p337_p13 = scmp.lt.s32.totalorder %s499_s14, 2 }
  0x11   : > { %s137_s25 = sand.u32 1, %s487_s11   ;;  %s317_s27 = sshll.u32 %s495_s13, 3 }
  0x12   : > { %s316_s26 = sshll.u32 %s137_s25, 3  ;;  %s146_s30 = scalar_lea.hbm %s639_s0, %s317_s27 }
  0x13   : > { %s141_s3 = scalar_lea.vmem [#allocation2], %s316_s26  ;;  %s148_s5 = sshll.u32 %s146_s30, 4  ;;  %s149_s5 = int_to_ptr.hbm [resolvable:$true] %s148_s5 }
  0x14   : > { %s150_s4 = sshll.u32 %s141_s3, 4  ;;  %p330_p0 = pnand %p337_p13, %p557_p4  ;;  %s151_s4 = int_to_ptr.vmem [resolvable:$true] %s150_s4 }
  0x15   : > { %p318_p1 = scmp.ge.s32.totalorder %s499_s14, 1  ;;  %p155_p2 = scmp.lt.s32.totalorder %s499_s14, 3 }
  0x16   : > { %s138_s6 = scalar_lea.sflag [#allocation3], %s137_s25 }
  0x17   : > { %332 = dma.hbm_to_vmem [thread:$0]  (!%p330_p0), %s149_s5, 128, %s151_s4, %s138_s6  }
  0x18   : > { %p156_p3 = pnand %p318_p1, %p155_p2 }
  0x19   : > { %s590_s7 = sand.u32 (!%p156_p3), 1, %s483_s10  }
  0x1a   : > { %159 = sbr.rel (%p156_p3) target bundleno = 47 (0x2f), region = 28  ;;  %s319_s8 = sshll.u32 (!%p156_p3), %s590_s7, 3 }
  0x1b   : > { %s162_s15 = scalar_lea.sflag (!%p156_p3), [#allocation3], %s590_s7  ;;  %s165_s16 = scalar_lea.vmem (!%p156_p3), [#allocation2], %s319_s8 }
  0x1f   : > { %470 = dma.done.wait (%p563_p8), %s162_s15, 128  }
  0x20   : > { %472 = vsyncadd (%p563_p8), %s162_s15, 4294967168  ;;  %s322_s18 = sshll.u32 %s491_s12, 3  ;;  %s190_s26 = scalar_lea.vmem [#allocation5], %s319_s8  ;;  %v195_v0 = vld [vmem:[%s165_s16] sm:$0xff] }
  0x21   : > { %s211_s25 = scalar_lea.hbm %s641_s2, %s322_s18  ;;  %s213_s27 = sshll.u32 %s190_s26, 4  ;;  %v196_v1 = vld [vmem:[%s640_s1] sm:$0xff]  ;;  %s214_s27 = int_to_ptr.vmem [resolvable:$true] %s213_s27 }
  0x22   : > { %s215_s28 = sshll.u32 %s211_s25, 4  ;;  %v197_v2 = vadd.f32 %v196_v1, %v195_v0  ;;  %s200_s21 = scalar_lea.sflag [#allocation4], %s590_s7  ;;  %s216_s28 = int_to_ptr.hbm [resolvable:$true] %s215_s28 }
  0x23   : > { %s431_s3 = sshra.s32 %s216_s28, 4  ;;  %s437_s6 = scalar_lea.hbm %s641_s2, 16  ;;  %s432_s3 = int_to_ptr.hbm [resolvable:$true] %s431_s3 }
  0x24   : > { %198 = vst [vmem:[%s190_s26] sm:$0xff] %v197_v2  ;;  %s433_s12 = scalar_lea.hbm %s432_s3, 8  ;;  %p438_p7 = scmp.lt.s32.totalorder %s432_s3, %s641_s2 }
  0x25   : > { %p434_p4 = scmp.ne.s32.totalorder %s432_s3, %s433_s12  ;;  %p439_p8 = scmp.lt.s32.totalorder %s437_s6, %s433_s12 }
  0x27   : > { %p435_p5 = pnand %p434_p4, %p567_p9  ;;  %p440_p10 = por %p439_p8, %p438_p7 }
  0x29   : > { %p436_p6 = pneg %p435_p5 }
  0x2b   : > { %p441_p13 = pnand %p440_p10, %p436_p6 }
  0x2d   : > { %444 = shalt.err (!%p441_p13)
}
  0x2e   : > { %327 = dma.vmem_to_hbm [thread:$0]  (%p567_p9), %s214_s27, 128, %s216_s28, %s200_s21  }
  0x2f PF: > { %s227_s7 = sand.u32 1, %s479_s9   ;;  %p334_p0 = pnand %p315_p12, %p574_p11 }
  0x30   : > { %s228_s16 = scalar_lea.sflag [#allocation4], %s227_s7 }
  0x31   : > { %p335_p1 = pneg %p334_p0 }
  0x33   : > { %474 = dma.done.wait (%p335_p1), %s228_s16, 128  }
  0x34   : > { %476 = vsyncadd (%p335_p1), %s228_s16, 4294967168  ;;  %s18_s14 = sadd.s32 1, %s499_s14   ;;  %s646_s9 = smov %s483_s10 }
  0x35   : > { %p15_p2 = scmp.ge.s32.totalorder %s18_s14, 4   ;;  %s647_s10 = smov %s487_s11 }
  0x36   : > { %s648_s11 = smov %s572_s23  ;;  %s649_s12 = smov %s495_s13 }
  0x37   : > { %s650_s13 = smov %s652_s17  ;;  %17 = sbr.rel (!%p15_p2) target bundleno = 6 (0x6), region = 76 }
  0x3c   :  { %234 = vsyncpa [#allocation3], 1 }
  0x3d   :  { %236 = vsyncpa [#allocation3 + $0x1], 1 }
  0x3e   :  { %237 = vsyncpa [#allocation4], 1 }
  0x3f   :  { %239 = vsyncpa [#allocation4 + $0x1], 1 }

</bundles_post_ra>
